<compile_context>
chip_gen: v7x
topology: tpu7x:2x2x1
jax: 0.10.0
libtpu: 0.0.40
codegen_flags: <defaults>
</compile_context>

<pallas_src>
import functools

import jax
import jax.numpy as jnp
from jax.experimental import pallas as pl
from jax.experimental.pallas import tpu as pltpu


def _window_sum_2d(xp, out_len, k):
    """Sliding-window sum of width k along axis 0 of xp (shape (P, tc)).

    Returns acc with acc[t] = sum_{j<k} xp[t+j] for t in [0, out_len),
    using power-of-two partial sums (~log2(k) + popcount(k) adds/element).
    """
    if k == 1:
        return xp[:out_len]

    # pow_sums[w][t] = sum_{j<w} xp[t+j], length P - w + 1.
    pow_sums = {1: xp}
    w = 1
    while 2 * w <= k:
        s = pow_sums[w]
        pow_sums[2 * w] = s[:-w] + s[w:]
        w *= 2

    # Compose k from its binary decomposition.
    acc = None
    offset = 0
    p = 1
    while p <= k:
        if k & p:
            piece = pow_sums[p][offset:offset + out_len]
            acc = piece if acc is None else acc + piece
            offset += p
        p *= 2
    return acc


def _moving_avg_kernel(x_ref, o_ref, *, kernel_size, front_pad, end_pad):
    # x_ref / o_ref: (tb, L, tc) blocks; seq on sublanes, channels on lanes.
    tb, L, tc = x_ref.shape
    inv_k = 1.0 / kernel_size

    for b in range(tb):                                   # static unroll
        x = x_ref[b].astype(jnp.float32)                  # (L, tc)

        # Edge-padded sequence (replicate first / last rows) built in VMEM.
        parts = []
        if front_pad > 0:
            parts.append(jnp.broadcast_to(x[0:1, :], (front_pad, tc)))
        parts.append(x)
        if end_pad > 0:
            parts.append(jnp.broadcast_to(x[L - 1:L, :], (end_pad, tc)))
        xp = jnp.concatenate(parts, axis=0) if len(parts) > 1 else x  # (L+k-1, tc)

        acc = _window_sum_2d(xp, L, kernel_size)          # (L, tc) f32
        o_ref[b] = (acc * inv_k).astype(o_ref.dtype)


def _pick_tiles(B, L, C, k, itemsize, budget_bytes=8 << 20, max_tb=8):
    """Choose (tb, tc): batch tile and lane-dense channel tile within a VMEM budget."""
    P = L + k - 1
    live = k.bit_length() + 3          # rough count of live f32 (P, tc) temporaries

    def bytes_per(tb, tc):
        temps = tb * P * tc * 4 * live             # f32 intermediates
        io = 2 * 2 * tb * L * tc * itemsize        # double-buffered in + out blocks
        return temps + io

    if C % 128 == 0:
        tc = 128
        t = 128
        while t <= C:
            if C % t == 0 and bytes_per(1, t) <= budget_bytes:
                tc = t
            t += 128
    else:
        tc = C                          # full extent (small / odd C path)

    tb = 1
    for t in range(2, min(B, max_tb) + 1):
        if B % t == 0 and bytes_per(t, tc) <= budget_bytes:
            tb = t
    return tb, tc


def moving_avg(x, kernel_size, stride=1):
    """Moving average over the sequence axis of x: (B, L, C) -> (B, L_out, C)."""
    B, L, C = x.shape
    k = kernel_size
    front_pad = k - 1 - (k - 1) // 2
    end_pad = (k - 1) // 2

    tb, tc = _pick_tiles(B, L, C, k, jnp.dtype(x.dtype).itemsize)
    grid = (B // tb, C // tc)

    out = pl.pallas_call(
        functools.partial(
            _moving_avg_kernel,
            kernel_size=k,
            front_pad=front_pad,
            end_pad=end_pad,
        ),
        out_shape=jax.ShapeDtypeStruct((B, L, C), x.dtype),
        grid_spec=pltpu.PrefetchScalarGridSpec(
            num_scalar_prefetch=0,
            grid=grid,
            in_specs=[pl.BlockSpec((tb, L, tc), lambda b, c: (b, 0, c))],
            out_specs=pl.BlockSpec((tb, L, tc), lambda b, c: (b, 0, c)),
        ),
        compiler_params=pltpu.CompilerParams(
            dimension_semantics=("parallel", "parallel"),
            vmem_limit_bytes=32 << 20,
        ),
    )(x)

    if stride != 1:
        # out[t] for stride s equals the stride-1 average at position t*s.
        out = out[:, ::stride, :]
    return out


def moving_avg_ref(x, kernel_size, stride):
    """Pure-JAX reference matching the PyTorch module exactly."""
    B, L, C = x.shape
    front_pad = kernel_size - 1 - (kernel_size - 1) // 2
    end_pad = (kernel_size - 1) // 2
    front = jnp.repeat(x[:, :1, :], front_pad, axis=1)
    end = jnp.repeat(x[:, -1:, :], end_pad, axis=1)
    xp = jnp.concatenate([front, x, end], axis=1)          # (B, L+k-1, C)
    L_out = (L - 1) // stride + 1
    windows = [
        jnp.mean(xp[:, t * stride:t * stride + kernel_size, :], axis=1)
        for t in range(L_out)
    ]
    return jnp.stack(windows, axis=1)


if __name__ == "__main__":
    key = jax.random.PRNGKey(0)
    batch, seq, channels = 2, 16, 32
    x = jax.random.normal(key, (batch, seq, channels), dtype=jnp.float32)

    # Config 1: typical time-series decomposition setting (k=5, stride=1).
    y = jax.block_until_ready(moving_avg(x, kernel_size=5, stride=1))
    y_ref = moving_avg_ref(x, 5, 1)
    assert y.shape == y_ref.shape, (y.shape, y_ref.shape)
    assert jnp.allclose(y, y_ref, atol=1e-5, rtol=1e-5), "mismatch (k=5, s=1)"

    # Config 2: even kernel + stride > 1 (exercises the subsample path).
    y2 = jax.block_until_ready(moving_avg(x, kernel_size=4, stride=2))
    y2_ref = moving_avg_ref(x, 4, 2)
    assert y2.shape == y2_ref.shape, (y2.shape, y2_ref.shape)
    assert jnp.allclose(y2, y2_ref, atol=1e-5, rtol=1e-5), "mismatch (k=4, s=2)"

    # Config 3: lane-dense channels (multiple of 128), batch tiling, large k,
    # bf16 I/O with f32 accumulation (exercises the doubling window sum).
    key3 = jax.random.PRNGKey(0)
    x3 = jax.random.normal(key3, (4, 24, 256), dtype=jnp.bfloat16)
    y3 = jax.block_until_ready(moving_avg(x3, kernel_size=25, stride=1))
    y3_ref = moving_avg_ref(x3.astype(jnp.float32), 25, 1)
    assert y3.shape == y3_ref.shape, (y3.shape, y3_ref.shape)
    assert jnp.allclose(y3.astype(jnp.float32), y3_ref, atol=2e-2, rtol=2e-2), \
        "mismatch (k=25, s=1, bf16)"

    print("KERNEL_OK")
</pallas_src>

<mosaic_0001>
module attributes {stable_mosaic.version = 11 : i64} {
  func.func @_moving_avg_kernel(%arg0: i32, %arg1: i32, %arg2: memref<2x16x32xf32, #tpu.memory_space<vmem>>, %arg3: memref<2x16x32xf32, #tpu.memory_space<vmem>>) attributes {dimension_semantics = [#tpu.dimension_semantics<parallel>, #tpu.dimension_semantics<parallel>], iteration_bounds = array<i64: 1, 1>, scalar_prefetch = 0 : i64, scratch_operands = 0 : i64, tpu.core_type = #tpu.core_type<tc>, window_params = [{transform_indices = @transform_0, window_bounds = array<i64: 2, 16, 32>}, {transform_indices = @transform_1, window_bounds = array<i64: 2, 16, 32>}]} {
    %c0 = arith.constant 0 : index
    %c0_0 = arith.constant 0 : index
    %c0_1 = arith.constant 0 : index
    %0 = vector.load %arg2[%c0, %c0_0, %c0_1] : memref<2x16x32xf32, #tpu.memory_space<vmem>>, vector<1x16x32xf32>
    %1 = vector.shape_cast %0 : vector<1x16x32xf32> to vector<16x32xf32>
    %2 = vector.extract_strided_slice %1 {offsets = [0, 0], sizes = [1, 32], strides = [1, 1]} : vector<16x32xf32> to vector<1x32xf32>
    %3 = vector.shape_cast %2 : vector<1x32xf32> to vector<1x32xf32>
    %4 = vector.broadcast %3 : vector<1x32xf32> to vector<2x32xf32>
    %5 = vector.extract_strided_slice %1 {offsets = [15, 0], sizes = [1, 32], strides = [1, 1]} : vector<16x32xf32> to vector<1x32xf32>
    %6 = vector.shape_cast %5 : vector<1x32xf32> to vector<1x32xf32>
    %7 = vector.broadcast %6 : vector<1x32xf32> to vector<2x32xf32>
    %8 = tpu.concatenate %4, %1, %7 in 0 : vector<2x32xf32>, vector<16x32xf32>, vector<2x32xf32> -> vector<20x32xf32>
    %9 = vector.extract_strided_slice %8 {offsets = [0, 0], sizes = [19, 32], strides = [1, 1]} : vector<20x32xf32> to vector<19x32xf32>
    %10 = vector.extract_strided_slice %8 {offsets = [1, 0], sizes = [19, 32], strides = [1, 1]} : vector<20x32xf32> to vector<19x32xf32>
    %11 = arith.addf %9, %10 : vector<19x32xf32>
    %12 = vector.extract_strided_slice %11 {offsets = [0, 0], sizes = [17, 32], strides = [1, 1]} : vector<19x32xf32> to vector<17x32xf32>
    %13 = vector.extract_strided_slice %11 {offsets = [2, 0], sizes = [17, 32], strides = [1, 1]} : vector<19x32xf32> to vector<17x32xf32>
    %14 = arith.addf %12, %13 : vector<17x32xf32>
    %15 = vector.extract_strided_slice %8 {offsets = [0, 0], sizes = [16, 32], strides = [1, 1]} : vector<20x32xf32> to vector<16x32xf32>
    %16 = vector.extract_strided_slice %14 {offsets = [1, 0], sizes = [16, 32], strides = [1, 1]} : vector<17x32xf32> to vector<16x32xf32>
    %17 = arith.addf %15, %16 : vector<16x32xf32>
    %cst = arith.constant 2.000000e-01 : f32
    %18 = vector.broadcast %cst : f32 to vector<16x32xf32>
    %19 = arith.mulf %17, %18 : vector<16x32xf32>
    %c0_2 = arith.constant 0 : index
    %c0_3 = arith.constant 0 : index
    %c0_4 = arith.constant 0 : index
    %20 = vector.load %arg3[%c0_2, %c0_3, %c0_4] : memref<2x16x32xf32, #tpu.memory_space<vmem>>, vector<1x16x32xf32>
    %21 = vector.shape_cast %20 : vector<1x16x32xf32> to vector<16x32xf32>
    %22 = vector.shape_cast %19 : vector<16x32xf32> to vector<1x16x32xf32>
    tpu.vector_store %arg3[%c0_2, %c0_3, %c0_4], %22 {strides = array<i32>} : memref<2x16x32xf32, #tpu.memory_space<vmem>>, vector<1x16x32xf32>,
    %c1 = arith.constant 1 : index
    %c0_5 = arith.constant 0 : index
    %c0_6 = arith.constant 0 : index
    %23 = vector.load %arg2[%c1, %c0_5, %c0_6] : memref<2x16x32xf32, #tpu.memory_space<vmem>>, vector<1x16x32xf32>
    %24 = vector.shape_cast %23 : vector<1x16x32xf32> to vector<16x32xf32>
    %25 = vector.extract_strided_slice %24 {offsets = [0, 0], sizes = [1, 32], strides = [1, 1]} : vector<16x32xf32> to vector<1x32xf32>
    %26 = vector.shape_cast %25 : vector<1x32xf32> to vector<1x32xf32>
    %27 = vector.broadcast %26 : vector<1x32xf32> to vector<2x32xf32>
    %28 = vector.extract_strided_slice %24 {offsets = [15, 0], sizes = [1, 32], strides = [1, 1]} : vector<16x32xf32> to vector<1x32xf32>
    %29 = vector.shape_cast %28 : vector<1x32xf32> to vector<1x32xf32>
    %30 = vector.broadcast %29 : vector<1x32xf32> to vector<2x32xf32>
    %31 = tpu.concatenate %27, %24, %30 in 0 : vector<2x32xf32>, vector<16x32xf32>, vector<2x32xf32> -> vector<20x32xf32>
    %32 = vector.extract_strided_slice %31 {offsets = [0, 0], sizes = [19, 32], strides = [1, 1]} : vector<20x32xf32> to vector<19x32xf32>
    %33 = vector.extract_strided_slice %31 {offsets = [1, 0], sizes = [19, 32], strides = [1, 1]} : vector<20x32xf32> to vector<19x32xf32>
    %34 = arith.addf %32, %33 : vector<19x32xf32>
    %35 = vector.extract_strided_slice %34 {offsets = [0, 0], sizes = [17, 32], strides = [1, 1]} : vector<19x32xf32> to vector<17x32xf32>
    %36 = vector.extract_strided_slice %34 {offsets = [2, 0], sizes = [17, 32], strides = [1, 1]} : vector<19x32xf32> to vector<17x32xf32>
    %37 = arith.addf %35, %36 : vector<17x32xf32>
    %38 = vector.extract_strided_slice %31 {offsets = [0, 0], sizes = [16, 32], strides = [1, 1]} : vector<20x32xf32> to vector<16x32xf32>
    %39 = vector.extract_strided_slice %37 {offsets = [1, 0], sizes = [16, 32], strides = [1, 1]} : vector<17x32xf32> to vector<16x32xf32>
    %40 = arith.addf %38, %39 : vector<16x32xf32>
    %cst_7 = arith.constant 2.000000e-01 : f32
    %41 = vector.broadcast %cst_7 : f32 to vector<16x32xf32>
    %42 = arith.mulf %40, %41 : vector<16x32xf32>
    %c1_8 = arith.constant 1 : index
    %c0_9 = arith.constant 0 : index
    %c0_10 = arith.constant 0 : index
    %43 = vector.load %arg3[%c1_8, %c0_9, %c0_10] : memref<2x16x32xf32, #tpu.memory_space<vmem>>, vector<1x16x32xf32>
    %44 = vector.shape_cast %43 : vector<1x16x32xf32> to vector<16x32xf32>
    %45 = vector.shape_cast %42 : vector<16x32xf32> to vector<1x16x32xf32>
    tpu.vector_store %arg3[%c1_8, %c0_9, %c0_10], %45 {strides = array<i32>} : memref<2x16x32xf32, #tpu.memory_space<vmem>>, vector<1x16x32xf32>,
    return
  }
  func.func @transform_0(%arg0: i32, %arg1: i32) -> (i32, i32, i32) {
    %c0_i32 = arith.constant 0 : i32
    %c0_i32_0 = arith.constant 0 : i32
    return %arg0, %c0_i32, %arg1 : i32, i32, i32
  }
  func.func @transform_1(%arg0: i32, %arg1: i32) -> (i32, i32, i32) {
    %c0_i32 = arith.constant 0 : i32
    %c0_i32_0 = arith.constant 0 : i32
    return %arg0, %c0_i32, %arg1 : i32, i32, i32
  }
}

</mosaic_0001>

<bundles_post_ra>
// kernel: tpu_custom_call.1
= control target key start
LH: loop header
LB: loop body
LE: loop exit
PB: predicated region body
PF: predicated region fallthrough
CT: control target
= control target key end

     0   :  { %6 = vsyncpa [#allocation3], 0  ;;  %s290_s0 = inlined_call_operand.hbm [shape: f32[2,16,32], index: 0, kind: input, shape index: {}]   ;;  %s291_s1 = inlined_call_operand.hbm [shape: f32[2,16,32], index: 1, kind: output, shape index: {}]  }
   0x1   :  { %7 = vsyncpa [#allocation4], 0  ;;  %s224_s6 = smov [#allocation2]   ;;  %s176_s10 = scalar_lea.hbm %s290_s0, 512 }
   0x2   :  { %s13_s7 = sshll.u32 %s224_s6, 4  ;;  %p177_p0 = scmp.ne.s32.totalorder %s290_s0, %s176_s10  ;;  %s14_s7 = int_to_ptr.vmem [resolvable:$true] %s13_s7 }
   0x3   :  { %p180_p1 = scmp.lt.u32.totalorder %s176_s10, %s290_s0 }
   0x5   :  { %p182_p2 = pnand %p180_p1, %p177_p0 }
   0x7   :  { %185 = shalt.err (!%p182_p2)
}
   0x8   :  { %s186_s15 = scalar_lea.vmem %s14_s7, 512  ;;  %p191_p4 = scmp.lt.s32.totalorder %s14_s7, %s14_s7 }
   0x9   :  { %p187_p3 = scmp.ne.s32.totalorder %s14_s7, %s186_s15  ;;  %p192_p5 = scmp.lt.s32.totalorder %s186_s15, %s186_s15 }
   0xb   :  { %p193_p6 = por %p192_p5, %p191_p4 }
   0xd   :  { %p194_p7 = pnand %p193_p6, %p187_p3 }
   0xf   :  { %197 = shalt.err (!%p194_p7)
}
  0x10   :  { %s225_s16 = smov 128   ;;  %s226_s17 = smov 8  }
  0x11   :  { %19 = dma.hbm_to_vmem [thread:$0]  %s290_s0, 512, %s14_s7, [#allocation3], %s225_s16, %s225_s16, %s226_s17  }
  0x12   :  { %220 = dma.done.wait [#allocation3], 512  }
  0x13   :  { %221 = vsyncadd [#allocation3], 4294966784  ;;  %v25_v0 = vlaneseq  ;;  %v23_v4 = vld [vmem:[#allocation2] sm:$0xff]  ;;  %v24_v5 = vld [vmem:[#allocation2 + $0x8] sm:$0xff]  ;;  %vm35_vm0 = vcmask 1041408   ;;  %vm46_vm1 = vcmask 1046528  }
  0x14   :  { %v92_v6 = vld [vmem:[#allocation2 + $0x18] sm:$0xff]  ;;  %v36_v9 = vrot.slane %v23_v4, 6  ;;  %v37_v10 = vrot.slane %v24_v5, 6  ;;  %v91_v11 = vld [vmem:[#allocation2 + $0x10] sm:$0xff]  ;;  %vm61_vm2 = vcmask 1045504   ;;  %vm87_vm3 = vcmask 261120  }
  0x15   :  { %v26_v1 = vshrl.u32 %v25_v0, 7  ;;  %v103_v14 = vrot.slane %v91_v11, 6  ;;  %v104_v15 = vrot.slane %v92_v6, 6  ;;  %s227_s0 = smov [#allocation5]  }
  0x16   :  { %v38_v16 = vsel %vm35_vm0, %v36_v9, %v37_v10  ;;  %s160_s20 = sshll.u32 %s227_s0, 4  ;;  %s161_s20 = int_to_ptr.vmem [resolvable:$true] %s160_s20 }
  0x17   :  { %v27_v2 = vsub.s32 0, %v26_v1  ;;  %v31_v3 = vsub.s32 7, %v26_v1  ;;  %v48_v20 = vrot.slane %v38_v16, 1  ;;  %v105_v22 = vsel %vm35_vm0, %v103_v14, %v104_v15  ;;  %s198_s21 = scalar_lea.vmem %s161_s20, 512  ;;  %p203_p9 = scmp.lt.s32.totalorder %s161_s20, %s161_s20 }
  0x18   :  { %v114_v25 = vrot.slane %v105_v22, 1  ;;  %p199_p8 = scmp.ne.s32.totalorder %s161_s20, %s198_s21  ;;  %p204_p10 = scmp.lt.s32.totalorder %s198_s21, %s198_s21 }
  0x19   :  { %v28_v7 = vrot.slane %v23_v4, %v27_v2  ;;  %v32_v8 = vrot.slane %v24_v5, %v31_v3  ;;  %v100_v12 = vrot.slane %v92_v6, %v31_v3  ;;  %v96_v13 = vrot.slane %v91_v11, %v27_v2 }
  0x1a   :  { %p205_p11 = por %p204_p10, %p203_p9 }
  0x1b   :  { %v42_v17 = vsel %vm35_vm0, %v28_v7, %v36_v9  ;;  %v43_v18 = vsel %vm35_vm0, %v37_v10, %v32_v8  ;;  %v109_v23 = vsel %vm35_vm0, %v96_v13, %v103_v14  ;;  %v110_v24 = vsel %vm35_vm0, %v104_v15, %v100_v12 }
  0x1c   :  { %v47_v19 = vrot.slane %v42_v17, 1  ;;  %v50_v21 = vrot.slane %v43_v18, 1  ;;  %v113_v29 = vrot.slane %v109_v23, 1  ;;  %v116_v32 = vrot.slane %v110_v24, 1  ;;  %p206_p12 = pnand %p205_p11, %p199_p8 }
  0x1e   :  { %v49_v26 = vsel %vm46_vm1, %v47_v19, %v48_v20  ;;  %v51_v27 = vsel %vm46_vm1, %v48_v20, %v50_v21  ;;  %v57_v28 = vadd.f32 %v50_v21, %v43_v18  ;;  %v115_v34 = vsel %vm46_vm1, %v113_v29, %v114_v25 }
  0x1f   :  { %v55_v30 = vadd.f32 %v49_v26, %v42_v17  ;;  %v56_v31 = vadd.f32 %v51_v27, %v38_v16  ;;  %v117_v37 = vsel %vm46_vm1, %v114_v25, %v116_v32  ;;  %v121_v38 = vadd.f32 %v115_v34, %v109_v23 }
  0x20   :  { %v65_v33 = vrot.slane %v57_v28, 2  ;;  %v122_v40 = vadd.f32 %v117_v37, %v105_v22  ;;  %v123_v41 = vadd.f32 %v116_v32, %v110_v24 }
  0x21   :  { %v62_v35 = vrot.slane %v55_v30, 2  ;;  %v63_v36 = vrot.slane %v56_v31, 2  ;;  %v127_v44 = vrot.slane %v121_v38, 2 }
  0x22   :  { %v72_v39 = vadd.f32 %v65_v33, %v57_v28  ;;  %v128_v48 = vrot.slane %v122_v40, 2  ;;  %v130_v49 = vrot.slane %v123_v41, 2 }
  0x23   :  { %v64_v42 = vsel %vm61_vm2, %v62_v35, %v63_v36  ;;  %v66_v43 = vsel %vm61_vm2, %v63_v36, %v65_v33 }
  0x24   :  { %v70_v45 = vadd.f32 %v64_v42, %v55_v30  ;;  %v71_v46 = vadd.f32 %v66_v43, %v56_v31  ;;  %v79_v47 = vrot.slane %v72_v39, 1  ;;  %v129_v52 = vsel %vm61_vm2, %v127_v44, %v128_v48 }
  0x25   :  { %v131_v53 = vsel %vm61_vm2, %v128_v48, %v130_v49  ;;  %v135_v54 = vadd.f32 %v129_v52, %v121_v38  ;;  %v137_v55 = vadd.f32 %v130_v49, %v123_v41 }
  0x26   :  { %v76_v50 = vrot.slane %v70_v45, 1  ;;  %v77_v51 = vrot.slane %v71_v46, 1  ;;  %v136_v58 = vadd.f32 %v131_v53, %v122_v40 }
  0x27   :  { %v141_v61 = vrot.slane %v135_v54, 1  ;;  %v144_v62 = vrot.slane %v137_v55, 1 }
  0x28   :  { %v78_v56 = vsel %vm46_vm1, %v76_v50, %v77_v51  ;;  %v80_v57 = vsel %vm46_vm1, %v77_v51, %v79_v47  ;;  %v142_v63 = vrot.slane %v136_v58, 1 }
  0x29   :  { %v83_v59 = vadd.f32 %v78_v56, %v42_v17  ;;  %v84_v60 = vadd.f32 %v80_v57, %v38_v16 }
  0x2a   :  { %v143_v2 = vsel %vm46_vm1, %v141_v61, %v142_v63  ;;  %v145_v3 = vsel %vm46_vm1, %v142_v63, %v144_v62 }
  0x2b   :  { %v85_v0 = vmul.f32 0.2, %v83_v59  ;;  %v86_v1 = vmul.f32 0.2, %v84_v60  ;;  %v148_v4 = vadd.f32 %v143_v2, %v109_v23  ;;  %v149_v5 = vadd.f32 %v145_v3, %v105_v22 }
  0x2d   :  { %88 = vst.msk [vmem:[#allocation5] sm:$0xff] %vm87_vm3, %v85_v0  ;;  %89 = vst.msk [vmem:[#allocation5 + $0x8] sm:$0xff] %vm87_vm3, %v86_v1  ;;  %v150_v6 = vmul.f32 0.2, %v148_v4  ;;  %v151_v7 = vmul.f32 0.2, %v149_v5 }
  0x2f   :  { %153 = vst.msk [vmem:[#allocation5 + $0x10] sm:$0xff] %vm87_vm3, %v150_v6  ;;  %154 = vst.msk [vmem:[#allocation5 + $0x18] sm:$0xff] %vm87_vm3, %v151_v7 }
  0x30   :  { %209 = shalt.err (!%p206_p12)
}
  0x31   :  { %s210_s24 = scalar_lea.hbm %s291_s1, 512 }
  0x32   :  { %p211_p13 = scmp.ne.s32.totalorder %s291_s1, %s210_s24  ;;  %p214_p0 = scmp.lt.u32.totalorder %s210_s24, %s291_s1 }
  0x34   :  { %p216_p1 = pnand %p214_p0, %p211_p13 }
  0x36   :  { %219 = shalt.err (!%p216_p1)
}
  0x37   :  { %166 = dma.vmem_to_hbm [thread:$0]  %s161_s20, 512, %s291_s1, [#allocation4], %s225_s16, %s225_s16, %s226_s17  }
  0x38   :  { %222 = dma.done.wait [#allocation4], 512  }
  0x39   :  { %223 = vsyncadd [#allocation4], 4294966784 }
  0x3a   :  { %170 = vsyncpa [#allocation3], 1 }
  0x3b   :  { %171 = vsyncpa [#allocation4], 1 }

</bundles_post_ra>
